<compile_context>
chip_gen: v7x
topology: tpu7x:2x2x1
jax: 0.10.0
libtpu: 0.0.40
codegen_flags: <defaults>
</compile_context>

<pallas_src>
import functools
import math

import jax
import jax.numpy as jnp
from jax.experimental import pallas as pl
from jax.experimental.pallas import tpu as pltpu


def _mlp_expert_kernel(x_ref, w1_ref, b1_ref, gamma_ref, beta_ref, w2_ref,
                       b2_ref, o_ref, hg_ref, *, s_chunk, approx_gelu):
    j = pl.program_id(1)

    # Stage 1 (mean -> Linear1 -> LayerNorm -> GELU) depends only on the batch
    # tile: compute it once (first output-column step) and keep it resident in
    # VMEM scratch across the j axis.
    @pl.when(j == 0)
    def _():
        tb, s_len, d = x_ref.shape
        inv_s = 1.0 / s_len

        # Chunked f32 accumulation over the sequence axis: only one
        # (tb, s_chunk, d) f32 temporary is live at a time instead of a full
        # f32 copy of the (tb, S, d) tile.
        acc = jnp.zeros((tb, d), jnp.float32)
        for s0 in range(0, s_len, s_chunk):
            s1 = min(s0 + s_chunk, s_len)
            acc = acc + jnp.sum(x_ref[:, s0:s1, :].astype(jnp.float32), axis=1)
        xm = (acc * inv_s).astype(w1_ref.dtype)   # native matmul operand dtype

        # Linear 1 (MXU, f32 accumulation).
        h = jnp.dot(xm, w1_ref[...], preferred_element_type=jnp.float32)
        h = h + b1_ref[...].astype(jnp.float32)

        # LayerNorm(hidden), eps = 1e-5, elementwise affine (f32 epilogue).
        mu = jnp.mean(h, axis=-1, keepdims=True)
        var = jnp.mean((h - mu) * (h - mu), axis=-1, keepdims=True)
        hn = (h - mu) * jax.lax.rsqrt(var + 1e-5)
        hn = hn * gamma_ref[...].astype(jnp.float32) \
             + beta_ref[...].astype(jnp.float32)

        if approx_gelu:
            # tanh approximation routes to the EUP (otherwise-idle slot);
            # slight numerics delta vs nn.GELU()'s exact erf.
            hg = jax.nn.gelu(hn, approximate=True)
        else:
            # Exact erf form matches nn.GELU() default.
            hg = 0.5 * hn * (1.0 + jax.lax.erf(hn * (1.0 / math.sqrt(2.0))))

        # Dropout: identity in eval mode.
        hg_ref[...] = hg.astype(hg_ref.dtype)

    # Stage 2: Linear 2 on the current output-column tile of w2 (MXU, f32 acc).
    out = jnp.dot(hg_ref[...], w2_ref[...], preferred_element_type=jnp.float32)
    out = out + b2_ref[...].astype(jnp.float32)
    o_ref[...] = out.astype(o_ref.dtype)


def _vmem_capacity_bytes():
    try:
        return int(pltpu.get_tpu_info().vmem_capacity_bytes)
    except Exception:
        return 64 * 1024 * 1024   # safe on every TPU generation


def mlp_expert(x, w1, b1, gamma, beta, w2, b2, *, block_b=None, block_n=None,
               matmul_dtype=None, approximate_gelu=False):
    """x: (B, S, D_in) or (B, D_in).  Returns (B, out_features) in x.dtype."""
    if x.ndim == 2:
        x = x[:, None, :]
    b1 = b1.reshape(1, -1)
    gamma = gamma.reshape(1, -1)
    beta = beta.reshape(1, -1)
    b2 = b2.reshape(1, -1)

    # Optional low-precision matmul operands (e.g. bf16 on v6e/v7x MXU);
    # accumulation stays f32.  Default keeps the PyTorch f32 numerics.
    if matmul_dtype is not None:
        w1 = w1.astype(matmul_dtype)
        w2 = w2.astype(matmul_dtype)

    B, S, D = x.shape
    H = w1.shape[1]
    N = w2.shape[1]
    out_dtype = x.dtype

    x_isz = jnp.dtype(x.dtype).itemsize
    w_isz = jnp.dtype(w1.dtype).itemsize
    o_isz = jnp.dtype(out_dtype).itemsize

    # ---- generation-aware VMEM budget (v7x: 64 MiB, v5e/v6e: 128 MiB) ------
    vmem_cap = _vmem_capacity_bytes()
    vmem_cap_limit = int(0.85 * vmem_cap)     # what we will ask the compiler for
    budget = int(0.80 * vmem_cap)             # what the tiles may consume

    # Single-buffered residents: w1, b1, gamma, beta.
    resident = (D * H + 3 * H) * w_isz

    # ---- output-column tile of w2 (lane-dense, multiple of 128) ------------
    if block_n is None:
        col_bytes = 2 * (H + 1) * w_isz       # double-buffered (H, tn) + (1, tn)
        tn = max(128, int(budget * 0.30) // max(1, col_bytes))
        tn = min(1024, (tn // 128) * 128)
    else:
        tn = block_n
    if N <= tn:
        tn = N
    else:
        tn = max(128, (tn // 128) * 128)

    # ---- batch tile ---------------------------------------------------------
    if block_b is None:
        per_row = (3 * S * D * x_isz          # triple-buffered x tile
                   + H * w_isz                # hg scratch
                   + 2 * tn * o_isz)          # double-buffered out tile
        avail = budget - resident - 2 * (H * tn + tn) * w_isz
        tb = max(8, avail // max(1, per_row))
        tb = max(8, min(512, (tb // 8) * 8))
    else:
        tb = block_b
    if B <= tb:
        if B >= 256:
            # Split so grid[0] >= 2 (v7x megacore) while keeping >=128 MXU rows.
            tb = max(128, ((pl.cdiv(B, 2) + 7) // 8) * 8)
        else:
            tb = B
    if B > tb:
        tb = max(8, (tb // 8) * 8)

    grid = (pl.cdiv(B, tb), pl.cdiv(N, tn))   # ragged last blocks, no padding

    # Sequence chunk for the f32 mean accumulator (~2 MiB f32 temp max).
    s_chunk = max(1, min(S, max(8, (2 * 1024 * 1024) // max(1, tb * D * 4))))

    # VMEM footprint estimate (worst case: residents double-buffered, x 3x).
    est = (3 * tb * S * D * x_isz
           + 2 * (D * H + 3 * H) * w_isz
           + 2 * (H * tn + tn) * w_isz
           + 2 * tb * tn * o_isz
           + tb * H * w_isz)
    vmem_limit = int(min(max(int(est * 1.15), 32 * 1024 * 1024), vmem_cap_limit))

    n_batch_tiles = pl.cdiv(B, tb)
    cost = pl.CostEstimate(
        flops=2 * B * S * D + 2 * B * D * H + 2 * B * H * N,
        transcendentals=B * H,
        bytes_accessed=(B * S * D * x_isz + D * H * w_isz
                        + n_batch_tiles * (H * N + N) * w_isz
                        + 3 * H * w_isz + B * N * o_isz))

    kernel = functools.partial(_mlp_expert_kernel, s_chunk=s_chunk,
                               approx_gelu=approximate_gelu)

    have_buffered = hasattr(pl, "Buffered")
    buf1 = pl.Buffered(1) if have_buffered else None
    buf3 = pl.Buffered(3) if have_buffered else None

    def _call(use_pipeline_modes):
        def spec(shape, imap, mode=None):
            if use_pipeline_modes and mode is not None:
                return pl.BlockSpec(shape, imap, pipeline_mode=mode)
            return pl.BlockSpec(shape, imap)

        return pl.pallas_call(
            kernel,
            out_shape=jax.ShapeDtypeStruct((B, N), out_dtype),
            grid_spec=pltpu.PrefetchScalarGridSpec(
                num_scalar_prefetch=0,
                grid=grid,
                in_specs=[
                    spec((tb, S, D), lambda i, j: (i, 0, 0), buf3),   # x tile
                    spec((D, H), lambda i, j: (0, 0), buf1),          # w1 resident
                    spec((1, H), lambda i, j: (0, 0), buf1),          # b1
                    spec((1, H), lambda i, j: (0, 0), buf1),          # gamma
                    spec((1, H), lambda i, j: (0, 0), buf1),          # beta
                    spec((H, tn), lambda i, j: (0, j)),               # w2 col tile
                    spec((1, tn), lambda i, j: (0, j)),               # b2
                ],
                out_specs=pl.BlockSpec((tb, tn), lambda i, j: (i, j)),
                scratch_shapes=[pltpu.VMEM((tb, H), w2.dtype)],       # GELU output
            ),
            compiler_params=pltpu.CompilerParams(
                dimension_semantics=("parallel", "arbitrary"),
                vmem_limit_bytes=vmem_limit),
            cost_estimate=cost,
        )(x, w1, b1, gamma, beta, w2, b2)

    if have_buffered:
        try:
            return _call(True)
        except Exception:
            pass  # fall back to default (double-buffered) pipelining
    return _call(False)


def init_params(key, input_size, hidden_size):
    """Deterministic PyTorch-style (uniform +/- 1/sqrt(fan_in)) init."""
    k1, k2, k3, k4 = jax.random.split(key, 4)
    lim1 = 1.0 / math.sqrt(input_size)
    lim2 = 1.0 / math.sqrt(hidden_size)
    w1 = jax.random.uniform(k1, (input_size, hidden_size), jnp.float32,
                            -lim1, lim1)
    b1 = jax.random.uniform(k2, (1, hidden_size), jnp.float32, -lim1, lim1)
    gamma = jnp.ones((1, hidden_size), jnp.float32)
    beta = jnp.zeros((1, hidden_size), jnp.float32)
    w2 = jax.random.uniform(k3, (hidden_size, hidden_size), jnp.float32,
                            -lim2, lim2)
    b2 = jax.random.uniform(k4, (1, hidden_size), jnp.float32, -lim2, lim2)
    return w1, b1, gamma, beta, w2, b2


def reference(x, w1, b1, gamma, beta, w2, b2):
    """Pure-JAX reference of the PyTorch forward (eval mode)."""
    if x.ndim == 3:
        x = jnp.mean(x, axis=1)
    hp = jax.lax.Precision.HIGHEST
    h = jnp.dot(x, w1, precision=hp) + b1
    mu = jnp.mean(h, axis=-1, keepdims=True)
    var = jnp.mean((h - mu) ** 2, axis=-1, keepdims=True)
    hn = (h - mu) / jnp.sqrt(var + 1e-5) * gamma + beta
    hg = 0.5 * hn * (1.0 + jax.lax.erf(hn / jnp.sqrt(2.0)))
    return jnp.dot(hg, w2, precision=hp) + b2


if __name__ == "__main__":
    key = jax.random.PRNGKey(0)
    kx, kp, kx2, kp2, kx3, kp3 = jax.random.split(key, 6)

    # Case 1: module-scale small shapes (single tile on each grid axis).
    B, S, D_IN, HIDDEN = 8, 8, 32, 32
    x = jax.random.normal(kx, (B, S, D_IN), jnp.float32)
    params = init_params(kp, D_IN, HIDDEN)
    out = jax.block_until_ready(mlp_expert(x, *params))
    ref = reference(x, *params)
    assert out.shape == (B, HIDDEN), out.shape
    assert jnp.allclose(out, ref, atol=1e-5, rtol=1e-5), \
        float(jnp.max(jnp.abs(out - ref)))

    # Case 2: exercises the (batch, out-column) grid, resident weights and the
    # pl.when-guarded scratch reuse (grid = (3, 2), exact tiling).
    B2, S2, D2, H2 = 24, 4, 64, 256
    x2 = jax.random.normal(kx2, (B2, S2, D2), jnp.float32)
    params2 = init_params(kp2, D2, H2)
    out2 = jax.block_until_ready(
        mlp_expert(x2, *params2, block_b=8, block_n=128))
    ref2 = reference(x2, *params2)
    assert out2.shape == (B2, H2), out2.shape
    assert jnp.allclose(out2, ref2, atol=1e-4, rtol=1e-4), \
        float(jnp.max(jnp.abs(out2 - ref2)))

    # Case 3: ragged last blocks on BOTH grid axes (no host-side padding and
    # no output slicing) — grid = (ceil(20/8), ceil(200/128)) = (3, 2).
    B3, S3, D3, H3 = 20, 5, 48, 200
    x3 = jax.random.normal(kx3, (B3, S3, D3), jnp.float32)
    params3 = init_params(kp3, D3, H3)
    out3 = jax.block_until_ready(
        mlp_expert(x3, *params3, block_b=8, block_n=128))
    ref3 = reference(x3, *params3)
    assert out3.shape == (B3, H3), out3.shape
    assert jnp.allclose(out3, ref3, atol=1e-4, rtol=1e-4), \
        float(jnp.max(jnp.abs(out3 - ref3)))

    print("KERNEL_OK")
</pallas_src>

<mosaic_0001>
module attributes {stable_mosaic.version = 11 : i64} {
  func.func @_mlp_expert_kernel(%arg0: i32, %arg1: i32, %arg2: memref<8x8x32xf32, #tpu.memory_space<vmem>>, %arg3: memref<32x32xf32, #tpu.memory_space<vmem>>, %arg4: memref<1x32xf32, #tpu.memory_space<vmem>>, %arg5: memref<1x32xf32, #tpu.memory_space<vmem>>, %arg6: memref<1x32xf32, #tpu.memory_space<vmem>>, %arg7: memref<32x32xf32, #tpu.memory_space<vmem>>, %arg8: memref<1x32xf32, #tpu.memory_space<vmem>>, %arg9: memref<8x32xf32, #tpu.memory_space<vmem>>, %arg10: memref<8x32xf32, #tpu.memory_space<vmem>>) attributes {dimension_semantics = [#tpu.dimension_semantics<parallel>, #tpu.dimension_semantics<arbitrary>], iteration_bounds = array<i64: 1, 1>, scalar_prefetch = 0 : i64, scratch_operands = 1 : i64, tpu.core_type = #tpu.core_type<tc>, window_params = [{transform_indices = @transform_0, window_bounds = array<i64: 8, 8, 32>}, {pipeline_mode = #tpu.pipeline_mode<synchronous>, transform_indices = @transform_1, window_bounds = array<i64: 32, 32>}, {pipeline_mode = #tpu.pipeline_mode<synchronous>, transform_indices = @transform_2, window_bounds = array<i64: 1, 32>}, {pipeline_mode = #tpu.pipeline_mode<synchronous>, transform_indices = @transform_3, window_bounds = array<i64: 1, 32>}, {pipeline_mode = #tpu.pipeline_mode<synchronous>, transform_indices = @transform_4, window_bounds = array<i64: 1, 32>}, {transform_indices = @transform_5, window_bounds = array<i64: 32, 32>}, {transform_indices = @transform_6, window_bounds = array<i64: 1, 32>}, {transform_indices = @transform_7, window_bounds = array<i64: 8, 32>}]} {
    %c0_i32 = arith.constant 0 : i32
    %0 = arith.cmpi eq, %arg1, %c0_i32 : i32
    %1 = arith.extui %0 : i1 to i32
    %c0_i32_0 = arith.constant 0 : i32
    %2 = arith.cmpi ne, %1, %c0_i32_0 : i32
    scf.if %2 {
      %cst_8 = arith.constant 0.000000e+00 : f32
      %10 = vector.broadcast %cst_8 : f32 to vector<8x32xf32>
      %c0_9 = arith.constant 0 : index
      %c0_10 = arith.constant 0 : index
      %c0_11 = arith.constant 0 : index
      %11 = vector.load %arg2[%c0_9, %c0_10, %c0_11] : memref<8x8x32xf32, #tpu.memory_space<vmem>>, vector<8x8x32xf32>
      %cst_12 = arith.constant dense<0.000000e+00> : vector<8x32xf32>
      %12 = vector.multi_reduction <add>, %11, %cst_12 [1] : vector<8x8x32xf32> to vector<8x32xf32>
      %13 = arith.addf %10, %12 : vector<8x32xf32>
      %cst_13 = arith.constant 1.250000e-01 : f32
      %14 = vector.broadcast %cst_13 : f32 to vector<8x32xf32>
      %15 = arith.mulf %13, %14 : vector<8x32xf32>
      %c0_14 = arith.constant 0 : index
      %c0_15 = arith.constant 0 : index
      %16 = vector.load %arg3[%c0_14, %c0_15] : memref<32x32xf32, #tpu.memory_space<vmem>>, vector<32x32xf32>
      %cst_16 = arith.constant dense<0.000000e+00> : vector<8x32xf32>
      %17 = tpu.matmul %15, %16, %cst_16 {dimension_numbers = #tpu.dot_dimension_numbers<[1], [0], [0], [1], [0, 0, 1, 1], [], []>} : vector<8x32xf32>, vector<32x32xf32>, vector<8x32xf32> -> vector<8x32xf32>
      %c0_17 = arith.constant 0 : index
      %c0_18 = arith.constant 0 : index
      %18 = vector.load %arg4[%c0_17, %c0_18] : memref<1x32xf32, #tpu.memory_space<vmem>>, vector<1x32xf32>
      %19 = vector.broadcast %18 : vector<1x32xf32> to vector<8x32xf32>
      %20 = arith.addf %17, %19 : vector<8x32xf32>
      %cst_19 = arith.constant dense<0.000000e+00> : vector<8xf32>
      %21 = vector.multi_reduction <add>, %20, %cst_19 [1] : vector<8x32xf32> to vector<8xf32>
      %22 = vector.shape_cast %21 : vector<8xf32> to vector<8x1xf32>
      %cst_20 = arith.constant 3.200000e+01 : f32
      %23 = vector.broadcast %cst_20 : f32 to vector<8x1xf32>
      %24 = arith.divf %22, %23 : vector<8x1xf32>
      %25 = vector.broadcast %24 : vector<8x1xf32> to vector<8x32xf32>
      %26 = arith.subf %20, %25 : vector<8x32xf32>
      %27 = vector.broadcast %24 : vector<8x1xf32> to vector<8x32xf32>
      %28 = arith.subf %20, %27 : vector<8x32xf32>
      %29 = arith.mulf %26, %28 : vector<8x32xf32>
      %cst_21 = arith.constant dense<0.000000e+00> : vector<8xf32>
      %30 = vector.multi_reduction <add>, %29, %cst_21 [1] : vector<8x32xf32> to vector<8xf32>
      %31 = vector.shape_cast %30 : vector<8xf32> to vector<8x1xf32>
      %cst_22 = arith.constant 3.200000e+01 : f32
      %32 = vector.broadcast %cst_22 : f32 to vector<8x1xf32>
      %33 = arith.divf %31, %32 : vector<8x1xf32>
      %34 = vector.broadcast %24 : vector<8x1xf32> to vector<8x32xf32>
      %35 = arith.subf %20, %34 : vector<8x32xf32>
      %cst_23 = arith.constant 9.99999974E-6 : f32
      %36 = vector.broadcast %cst_23 : f32 to vector<8x1xf32>
      %37 = arith.addf %33, %36 : vector<8x1xf32>
      %38 = math.rsqrt %37 : vector<8x1xf32>
      %39 = vector.broadcast %38 : vector<8x1xf32> to vector<8x32xf32>
      %40 = arith.mulf %35, %39 : vector<8x32xf32>
      %c0_24 = arith.constant 0 : index
      %c0_25 = arith.constant 0 : index
      %41 = vector.load %arg5[%c0_24, %c0_25] : memref<1x32xf32, #tpu.memory_space<vmem>>, vector<1x32xf32>
      %42 = vector.broadcast %41 : vector<1x32xf32> to vector<8x32xf32>
      %43 = arith.mulf %40, %42 : vector<8x32xf32>
      %c0_26 = arith.constant 0 : index
      %c0_27 = arith.constant 0 : index
      %44 = vector.load %arg6[%c0_26, %c0_27] : memref<1x32xf32, #tpu.memory_space<vmem>>, vector<1x32xf32>
      %45 = vector.broadcast %44 : vector<1x32xf32> to vector<8x32xf32>
      %46 = arith.addf %43, %45 : vector<8x32xf32>
      %cst_28 = arith.constant 5.000000e-01 : f32
      %47 = vector.broadcast %cst_28 : f32 to vector<8x32xf32>
      %48 = arith.mulf %47, %46 : vector<8x32xf32>
      %cst_29 = arith.constant 0.707106769 : f32
      %49 = vector.broadcast %cst_29 : f32 to vector<8x32xf32>
      %50 = arith.mulf %46, %49 : vector<8x32xf32>
      %51 = math.erf %50 : vector<8x32xf32>
      %cst_30 = arith.constant 1.000000e+00 : f32
      %52 = vector.broadcast %cst_30 : f32 to vector<8x32xf32>
      %53 = arith.addf %52, %51 : vector<8x32xf32>
      %54 = arith.mulf %48, %53 : vector<8x32xf32>
      %c0_31 = arith.constant 0 : index
      %c0_32 = arith.constant 0 : index
      %55 = vector.load %arg10[%c0_31, %c0_32] : memref<8x32xf32, #tpu.memory_space<vmem>>, vector<8x32xf32>
      tpu.vector_store %arg10[%c0_31, %c0_32], %54 {strides = array<i32>} : memref<8x32xf32, #tpu.memory_space<vmem>>, vector<8x32xf32>,
    } else {
    }
    %c0 = arith.constant 0 : index
    %c0_1 = arith.constant 0 : index
    %3 = vector.load %arg10[%c0, %c0_1] : memref<8x32xf32, #tpu.memory_space<vmem>>, vector<8x32xf32>
    %c0_2 = arith.constant 0 : index
    %c0_3 = arith.constant 0 : index
    %4 = vector.load %arg7[%c0_2, %c0_3] : memref<32x32xf32, #tpu.memory_space<vmem>>, vector<32x32xf32>
    %cst = arith.constant dense<0.000000e+00> : vector<8x32xf32>
    %5 = tpu.matmul %3, %4, %cst {dimension_numbers = #tpu.dot_dimension_numbers<[1], [0], [0], [1], [0, 0, 1, 1], [], []>} : vector<8x32xf32>, vector<32x32xf32>, vector<8x32xf32> -> vector<8x32xf32>
    %c0_4 = arith.constant 0 : index
    %c0_5 = arith.constant 0 : index
    %6 = vector.load %arg8[%c0_4, %c0_5] : memref<1x32xf32, #tpu.memory_space<vmem>>, vector<1x32xf32>
    %7 = vector.broadcast %6 : vector<1x32xf32> to vector<8x32xf32>
    %8 = arith.addf %5, %7 : vector<8x32xf32>
    %c0_6 = arith.constant 0 : index
    %c0_7 = arith.constant 0 : index
    %9 = vector.load %arg9[%c0_6, %c0_7] : memref<8x32xf32, #tpu.memory_space<vmem>>, vector<8x32xf32>
    tpu.vector_store %arg9[%c0_6, %c0_7], %8 {strides = array<i32>} : memref<8x32xf32, #tpu.memory_space<vmem>>, vector<8x32xf32>,
    return
  }
  func.func @transform_0(%arg0: i32, %arg1: i32) -> (i32, i32, i32) {
    %c0_i32 = arith.constant 0 : i32
    %c0_i32_0 = arith.constant 0 : i32
    %c0_i32_1 = arith.constant 0 : i32
    return %arg0, %c0_i32, %c0_i32_0 : i32, i32, i32
  }
  func.func @transform_1(%arg0: i32, %arg1: i32) -> (i32, i32) {
    %c0_i32 = arith.constant 0 : i32
    %c0_i32_0 = arith.constant 0 : i32
    %c0_i32_1 = arith.constant 0 : i32
    return %c0_i32, %c0_i32_0 : i32, i32
  }
  func.func @transform_2(%arg0: i32, %arg1: i32) -> (i32, i32) {
    %c0_i32 = arith.constant 0 : i32
    %c0_i32_0 = arith.constant 0 : i32
    %c0_i32_1 = arith.constant 0 : i32
    return %c0_i32, %c0_i32_0 : i32, i32
  }
  func.func @transform_3(%arg0: i32, %arg1: i32) -> (i32, i32) {
    %c0_i32 = arith.constant 0 : i32
    %c0_i32_0 = arith.constant 0 : i32
    %c0_i32_1 = arith.constant 0 : i32
    return %c0_i32, %c0_i32_0 : i32, i32
  }
  func.func @transform_4(%arg0: i32, %arg1: i32) -> (i32, i32) {
    %c0_i32 = arith.constant 0 : i32
    %c0_i32_0 = arith.constant 0 : i32
    %c0_i32_1 = arith.constant 0 : i32
    return %c0_i32, %c0_i32_0 : i32, i32
  }
  func.func @transform_5(%arg0: i32, %arg1: i32) -> (i32, i32) {
    %c0_i32 = arith.constant 0 : i32
    %c0_i32_0 = arith.constant 0 : i32
    return %c0_i32, %arg1 : i32, i32
  }
  func.func @transform_6(%arg0: i32, %arg1: i32) -> (i32, i32) {
    %c0_i32 = arith.constant 0 : i32
    %c0_i32_0 = arith.constant 0 : i32
    return %c0_i32, %arg1 : i32, i32
  }
  func.func @transform_7(%arg0: i32, %arg1: i32) -> (i32, i32) {
    %c0_i32 = arith.constant 0 : i32
    return %arg0, %arg1 : i32, i32
  }
}

</mosaic_0001>

<bundles_post_ra>
// kernel: tpu_custom_call.1
= control target key start
LH: loop header
LB: loop body
LE: loop exit
PB: predicated region body
PF: predicated region fallthrough
CT: control target
= control target key end

     0   :  { %12 = vsyncpa [#allocation4], 0  ;;  %s701_s0 = inlined_call_operand.hbm [shape: f32[8,8,32], index: 0, kind: input, shape index: {}]   ;;  %s702_s1 = inlined_call_operand.hbm [shape: f32[32,32], index: 1, kind: input, shape index: {}]   ;;  %s703_s2 = inlined_call_operand.vmem [shape: f32[1,32], index: 2, kind: input, shape index: {}]   ;;  %s704_s3 = inlined_call_operand.vmem [shape: f32[1,32], index: 3, kind: input, shape index: {}]   ;;  %s705_s4 = inlined_call_operand.vmem [shape: f32[1,32], index: 4, kind: input, shape index: {}]   ;;  %s706_s5 = inlined_call_operand.hbm [shape: f32[32,32], index: 5, kind: input, shape index: {}]   ;;  %s707_s6 = inlined_call_operand.vmem [shape: f32[1,32], index: 6, kind: input, shape index: {}]   ;;  %s708_s7 = inlined_call_operand.hbm [shape: f32[8,32], index: 7, kind: output, shape index: {}]  }
   0x1   :  { %13 = vsyncpa [#allocation7], 0 }
   0x2   :  { %14 = vsyncpa [#allocation5], 0  ;;  %s554_s24 = smov [#allocation6]   ;;  %s555_s26 = smov [#allocation3]  }
   0x3   :  { %s32_s25 = sshll.u32 %s554_s24, 4  ;;  %s20_s27 = sshll.u32 %s555_s26, 4  ;;  %s33_s25 = int_to_ptr.vmem [resolvable:$true] %s32_s25  ;;  %s603_s27 = int_to_ptr.vmem [resolvable:$true] %s20_s27 }
   0x4   :  { %s460_s30 = scalar_lea.hbm %s702_s1, 512 }
   0x5   :  { %p461_p0 = scmp.ne.s32.totalorder %s702_s1, %s460_s30  ;;  %p464_p1 = scmp.lt.u32.totalorder %s460_s30, %s702_s1 }
   0x7   :  { %p466_p2 = pnand %p464_p1, %p461_p0 }
   0x9   :  { %469 = shalt.err (!%p466_p2)
}
   0xa   :  { %s470_s12 = scalar_lea.vmem %s33_s25, 512  ;;  %p475_p4 = scmp.lt.s32.totalorder %s33_s25, %s33_s25 }
   0xb   :  { %p471_p3 = scmp.ne.s32.totalorder %s33_s25, %s470_s12  ;;  %p476_p5 = scmp.lt.s32.totalorder %s470_s12, %s470_s12 }
   0xd   :  { %p477_p6 = por %p476_p5, %p475_p4 }
   0xf   :  { %p478_p7 = pnand %p477_p6, %p471_p3 }
  0x11   :  { %481 = shalt.err (!%p478_p7)
}
  0x12   :  { %s556_s13 = smov 128   ;;  %s557_s14 = smov 8  }
  0x13   :  { %38 = dma.hbm_to_vmem [thread:$0]  %s702_s1, 512, %s33_s25, [#allocation7], %s556_s13, %s556_s13, %s557_s14  }
  0x14   :  { %s482_s19 = scalar_lea.hbm %s701_s0, 1024 }
  0x15   :  { %p483_p8 = scmp.ne.s32.totalorder %s701_s0, %s482_s19  ;;  %p486_p9 = scmp.lt.u32.totalorder %s482_s19, %s701_s0 }
  0x17   :  { %p488_p10 = pnand %p486_p9, %p483_p8 }
  0x19   :  { %491 = shalt.err (!%p488_p10)
}
  0x1a   :  { %s492_s24 = scalar_lea.vmem %s603_s27, 1024  ;;  %p497_p12 = scmp.lt.s32.totalorder %s603_s27, %s603_s27 }
  0x1b   :  { %p493_p11 = scmp.ne.s32.totalorder %s603_s27, %s492_s24  ;;  %p498_p13 = scmp.lt.s32.totalorder %s492_s24, %s492_s24 }
  0x1d   :  { %p499_p0 = por %p498_p13, %p497_p12 }
  0x1f   :  { %p500_p1 = pnand %p499_p0, %p493_p11 }
  0x21   :  { %503 = shalt.err (!%p500_p1)
}
  0x22   :  { %26 = dma.hbm_to_vmem [thread:$0]  %s701_s0, 1024, %s603_s27, [#allocation4], %s556_s13, %s556_s13, %s557_s14  }
  0x23   :  { %s558_s26 = smov [#allocation8]   ;;  %s504_s8 = scalar_lea.hbm %s706_s5, 512 }
  0x24   :  { %s50_s28 = sshll.u32 %s558_s26, 4  ;;  %p505_p2 = scmp.ne.s32.totalorder %s706_s5, %s504_s8  ;;  %s51_s28 = int_to_ptr.vmem [resolvable:$true] %s50_s28 }
  0x25   :  { %p508_p3 = scmp.lt.u32.totalorder %s504_s8, %s706_s5 }
  0x27   :  { %p510_p4 = pnand %p508_p3, %p505_p2 }
  0x29   :  { %513 = shalt.err (!%p510_p4)
}
  0x2a   :  { %s514_s15 = scalar_lea.vmem %s51_s28, 512  ;;  %p519_p6 = scmp.lt.s32.totalorder %s51_s28, %s51_s28 }
  0x2b   :  { %p515_p5 = scmp.ne.s32.totalorder %s51_s28, %s514_s15  ;;  %p520_p7 = scmp.lt.s32.totalorder %s514_s15, %s514_s15 }
  0x2d   :  { %p521_p8 = por %p520_p7, %p519_p6 }
  0x2f   :  { %p522_p9 = pnand %p521_p8, %p515_p5 }
  0x31   :  { %525 = shalt.err (!%p522_p9)
}
  0x32   :  { %56 = dma.hbm_to_vmem [thread:$0]  %s706_s5, 512, %s51_s28, [#allocation7], %s556_s13, %s556_s13, %s557_s14  }
  0x33   :  { %548 = dma.done.wait [#allocation4], 1024  }
  0x34   :  { %549 = vsyncadd [#allocation4], 4294966272 }
  0x35   :  { %550 = dma.done.wait [#allocation7], 1024  }
  0x36   :  { %551 = vsyncadd [#allocation7], 4294966272  ;;  %v559_v0 = vmov 0.0|0.0   ;;  %vm560_vm0 = vmmov 0   ;;  %v561_v1 = vmov 0.0   ;;  %vm80_vm1 = vcmask 261120  }
  0x37   :  { %435 = vmatprep.subr.bf16.mxu0 %v559_v0  ;;  %421 = vmatprep.mubr.msk.f32.mxu0 %vm560_vm0, %v561_v1  ;;  %v153_v2 = vld [vmem:[#allocation6] sm:$0xff]  ;;  %v154_v3 = vld [vmem:[#allocation6 + $0x8] sm:$0xff]  ;;  %v155_v4 = vld [vmem:[#allocation6 + $0x10] sm:$0xff]  ;;  %vm172_vm2 = vcmask 1041409   ;;  %vm174_vm3 = vcmask 1042434   ;;  %vm176_vm4 = vcmask 1043459  }
  0x38   :  { %441 = vmatprep.subr.bf16.mxu1 %v559_v0  ;;  %432 = vmatprep.mubr.msk.f32.mxu1 %vm560_vm0, %v561_v1  ;;  %v436_v5 = vpack.c.bf16 %v154_v3, %v153_v2  ;;  %v156_v6 = vld [vmem:[#allocation6 + $0x18] sm:$0xff]  ;;  %v72_v7 = vld [vmem:[#allocation3] sm:$0xff]  ;;  %v73_v8 = vld [vmem:[#allocation3 + $0x8] sm:$0xff]  ;;  %vm178_vm5 = vcmask 1044484   ;;  %vm180_vm6 = vcmask 1045509   ;;  %vm182_vm7 = vcmask 1046534  }
  0x39   :  { %v74_v9 = vld [vmem:[#allocation3 + $0x10] sm:$0xff]  ;;  %v75_v10 = vld [vmem:[#allocation3 + $0x18] sm:$0xff]  ;;  %v76_v11 = vld [vmem:[#allocation3 + $0x20] sm:$0xff]  ;;  %v81_v12 = vsel %vm80_vm1, %v72_v7, 0.0  ;;  %v88_v13 = vsel %vm80_vm1, %v73_v8, 0.0  ;;  %v439_v14 = vpack.c.bf16 %v156_v6, %v155_v4  ;;  %vm184_vm8 = vcmask 1047559  }
  0x3a   :  { %437 = vmatpush3.bf16.msra.mxu0 %v436_v5  ;;  %v77_v15 = vld [vmem:[#allocation3 + $0x28] sm:$0xff]  ;;  %v78_v16 = vld [vmem:[#allocation3 + $0x30] sm:$0xff]  ;;  %v79_v17 = vld [vmem:[#allocation3 + $0x38] sm:$0xff]  ;;  %v82_v18 = vrot.slane %v81_v12, 4  ;;  %v89_v19 = vrot.slane %v88_v13, 4  ;;  %v95_v20 = vsel %vm80_vm1, %v74_v9, 0.0 }
  0x3b   :  { %438 = vmatprep.subr.bf16.mxu0 %v559_v0  ;;  %v96_v21 = vrot.slane %v95_v20, 4  ;;  %v102_v22 = vsel %vm80_vm1, %v75_v10, 0.0  ;;  %v109_v23 = vsel %vm80_vm1, %v76_v11, 0.0  ;;  %v116_v24 = vsel %vm80_vm1, %v77_v15, 0.0  ;;  %s562_s19 = smov [#allocation9]  }
  0x3c   :  { %v83_v25 = vadd.f32 %v82_v18, %v81_v12  ;;  %v90_v26 = vadd.f32 %v89_v19, %v88_v13  ;;  %v103_v27 = vrot.slane %v102_v22, 4  ;;  %v110_v28 = vrot.slane %v109_v23, 4  ;;  %s387_s20 = sshll.u32 %s562_s19, 4  ;;  %s388_s20 = int_to_ptr.vmem [resolvable:$true] %s387_s20 }
  0x3d   :  { %v97_v29 = vadd.f32 %v96_v21, %v95_v20  ;;  %v117_v30 = vrot.slane %v116_v24, 4  ;;  %v123_v31 = vsel %vm80_vm1, %v78_v16, 0.0  ;;  %v130_v32 = vsel %vm80_vm1, %v79_v17, 0.0  ;;  %p531_p11 = scmp.lt.s32.totalorder %s388_s20, %s388_s20 }
  0x3e   :  { %440 = vmatpush3.bf16.msra.mxu0 %v439_v14  ;;  %v84_v33 = vrot.slane %v83_v25, 2  ;;  %v91_v34 = vrot.slane %v90_v26, 2  ;;  %v104_v35 = vadd.f32 %v103_v27, %v102_v22  ;;  %v111_v36 = vadd.f32 %v110_v28, %v109_v23 }
  0x3f   :  { %v98_v37 = vrot.slane %v97_v29, 2  ;;  %v118_v38 = vadd.f32 %v117_v30, %v116_v24  ;;  %v124_v39 = vrot.slane %v123_v31, 4  ;;  %v131_v40 = vrot.slane %v130_v32, 4  ;;  %v397_v24 = vld [vmem:[%s703_s2] ss:$0 sm:$0xff] }
  0x40   :  { %v85_v41 = vadd.f32 %v84_v33, %v83_v25  ;;  %v92_v42 = vadd.f32 %v91_v34, %v90_v26  ;;  %v105_v43 = vrot.slane %v104_v35, 2  ;;  %v112_v44 = vrot.slane %v111_v36, 2  ;;  %v295_v34 = vld [vmem:[#allocation8] sm:$0xff] }
  0x41   :  { %v99_v45 = vadd.f32 %v98_v37, %v97_v29  ;;  %v119_v46 = vrot.slane %v118_v38, 2  ;;  %v125_v47 = vadd.f32 %v124_v39, %v123_v31  ;;  %v132_v48 = vadd.f32 %v131_v40, %v130_v32  ;;  %v297_v37 = vld [vmem:[#allocation8 + $0x10] sm:$0xff] }
  0x42   :  { %v86_v49 = vrot.slane %v85_v41, 1  ;;  %v93_v50 = vrot.slane %v92_v42, 1  ;;  %v106_v51 = vadd.f32 %v105_v43, %v104_v35  ;;  %v113_v52 = vadd.f32 %v112_v44, %v111_v36  ;;  %v296_v35 = vld [vmem:[#allocation8 + $0x8] sm:$0xff]  ;;  %v399_v44 = vld [vmem:[%s704_s3] ss:$0 sm:$0xff] }
  0x43   :  { %v100_v53 = vrot.slane %v99_v45, 1  ;;  %v120_v54 = vadd.f32 %v119_v46, %v118_v38  ;;  %v126_v55 = vrot.slane %v125_v47, 2  ;;  %v133_v56 = vrot.slane %v132_v48, 2  ;;  %v298_v38 = vld [vmem:[#allocation8 + $0x18] sm:$0xff] }
  0x44   :  { %v87_v57 = vadd.f32 %v86_v49, %v85_v41  ;;  %v94_v58 = vadd.f32 %v93_v50, %v92_v42  ;;  %v107_v59 = vrot.slane %v106_v51, 1  ;;  %v114_v60 = vrot.slane %v113_v52, 1  ;;  %v400_v46 = vld [vmem:[%s705_s4] ss:$0 sm:$0xff]  ;;  %s526_s4 = scalar_lea.vmem %s388_s20, 128 }
  0x45   :  { %v101_v61 = vadd.f32 %v100_v53, %v99_v45  ;;  %v121_v62 = vrot.slane %v120_v54, 1  ;;  %v127_v63 = vadd.f32 %v126_v55, %v125_v47  ;;  %v134_v1 = vadd.f32 %v133_v56, %v132_v48  ;;  %p527_p10 = scmp.ne.s32.totalorder %s388_s20, %s526_s4  ;;  %p532_p12 = scmp.lt.s32.totalorder %s526_s4, %s526_s4 }
  0x46   :  { %v108_v2 = vadd.f32 %v107_v59, %v106_v51  ;;  %v115_v3 = vadd.f32 %v114_v60, %v113_v52  ;;  %v145_v4 = vmul.f32 0.125, %v87_v57  ;;  %v146_v5 = vmul.f32 0.125, %v94_v58 }
  0x47   :  { %v122_v6 = vadd.f32 %v121_v62, %v120_v54  ;;  %v128_v7 = vrot.slane %v127_v63, 1  ;;  %v135_v8 = vrot.slane %v134_v1, 1  ;;  %v147_v9 = vmul.f32 0.125, %v101_v61  ;;  %v401_v54 = vld [vmem:[%s707_s6] ss:$0 sm:$0xff]  ;;  %p533_p13 = por %p532_p12, %p531_p11 }
  0x48   :  { %v148_v10 = vmul.f32 0.125, %v108_v2  ;;  %v149_v11 = vmul.f32 0.125, %v115_v3  ;;  %v173_v12 = vsel %vm172_vm2, %v146_v5, %v145_v4  ;;  %v442_v36 = vpack.c.bf16 %v296_v35, %v295_v34 }
  0x49   :  { %v129_v13 = vadd.f32 %v128_v7, %v127_v63  ;;  %v136_v14 = vadd.f32 %v135_v8, %v134_v1  ;;  %v150_v15 = vmul.f32 0.125, %v122_v6  ;;  %v175_v16 = vsel %vm174_vm3, %v147_v9, %v173_v12  ;;  %p534_p0 = pnand %p533_p13, %p527_p10 }
  0x4a   :  { %v177_v17 = vsel %vm176_vm4, %v148_v10, %v175_v16  ;;  %443 = vmatpush3.bf16.msra.mxu1 %v442_v36  ;;  %v445_v39 = vpack.c.bf16 %v298_v38, %v297_v37 }
  0x4b   :  { %v151_v18 = vmul.f32 0.125, %v129_v13  ;;  %v152_v19 = vmul.f32 0.125, %v136_v14  ;;  %v179_v20 = vsel %vm178_vm5, %v149_v11, %v177_v17  ;;  %444 = vmatprep.subr.bf16.mxu1 %v559_v0 }
  0x4c   :  { %v181_v21 = vsel %vm180_vm6, %v150_v15, %v179_v20 }
  0x4d   :  { %v183_v22 = vsel %vm182_vm7, %v151_v18, %v181_v21 }
  0x4e   :  { %v185_v23 = vsel %vm184_vm8, %v152_v19, %v183_v22  ;;  %446 = vmatpush3.bf16.msra.mxu1 %v445_v39 }
  0x4f   :  { %422 = vmatmul.mubr.msk.f32.vlgmr.msra.gmra.mrb[0].mxu0 %vm80_vm1, %v185_v23 }
 0x122   :  { %v254_v25 = vpop.f32.mrb[0].mxu0 }
 0x123   :  { %v255_v26 = vadd.f32 %v397_v24, %v254_v25  ;;  %v423_v27 = vpop.f32.mrb[1].mxu0 }
 0x125   :  { %v258_v28 = vsel %vm80_vm1, %v255_v26, 0.0 }
 0x126   :  { %259 = vadd.xlane.f32.xlu0 %v258_v28 }
 0x1b3   :  { %v260_v29 = vpop.xlane.xlu0 %259 }
 0x1b4   :  { %v262_v30 = vmul.f32 0.03125, %v260_v29 }
 0x1b6   :  { %v263_v31 = vsub.f32 %v255_v26, %v262_v30 }
 0x1b8   :  { %v264_v32 = vmul.f32 %v263_v31, %v263_v31 }
 0x1ba   :  { %v265_v33 = vsel %vm80_vm1, %v264_v32, 0.0 }
 0x1bb   :  { %266 = vadd.xlane.f32.xlu0 %v265_v33 }
 0x248   :  { %v267_v40 = vpop.xlane.xlu0 %266 }
 0x249   :  { %v268_v41 = vmul.f32 0.03125, %v267_v40 }
 0x24b   :  { %v269_v42 = vadd.f32 1e-05, %v268_v41 }
 0x24d   :  { %456 = vrsqrt.f32 %v269_v42 }
 0x257   :  { %v457_v43 = vpop.eup %456 }
 0x258   :  { %v271_v45 = vmul.f32 %v457_v43, %v263_v31 }
 0x25a   :  { %v279_v47 = vmul.f32 %v399_v44, %v271_v45 }
 0x25c   :  { %v287_v48 = vadd.f32 %v400_v46, %v279_v47 }
 0x25e   :  { %v289_v49 = vmul.f32 0.70710677, %v287_v48  ;;  %v288_v50 = vmul.f32 0.5, %v287_v48 }
 0x260   :  { %458 = verf.f32 %v289_v49 }
 0x26a   :  { %v459_v0 = vpop.eup %458 }
 0x26b   :  { %v291_v51 = vadd.f32 1.0, %v459_v0 }
 0x26d   :  { %v292_v52 = vmul.f32 %v291_v51, %v288_v50 }
 0x26f   :  { %293 = vst.msk [vmem:[#allocation2] sm:$0xff] %vm80_vm1, %v292_v52 }
 0x276   :  { %v294_v53 = vld [vmem:[#allocation2] sm:$0xff] }
 0x277   :  { %433 = vmatmul.mubr.msk.f32.vlgmr.msra.gmra.mrb[0].mxu1 %vm80_vm1, %v294_v53 }
 0x34a   :  { %v376_v55 = vpop.f32.mrb[0].mxu1 }
 0x34b   :  { %v377_v56 = vadd.f32 %v401_v54, %v376_v55  ;;  %v434_v57 = vpop.f32.mrb[1].mxu1 }
 0x34d   :  { %380 = vst.msk [vmem:[#allocation9] sm:$0xff] %vm80_vm1, %v377_v56 }
 0x34e   :  { %537 = shalt.err (!%p534_p0)
}
 0x34f   :  { %s538_s23 = scalar_lea.hbm %s708_s7, 128 }
 0x350   :  { %p539_p1 = scmp.ne.s32.totalorder %s708_s7, %s538_s23  ;;  %p542_p2 = scmp.lt.u32.totalorder %s538_s23, %s708_s7 }
 0x352   :  { %p544_p3 = pnand %p542_p2, %p539_p1 }
 0x354   :  { %547 = shalt.err (!%p544_p3)
}
 0x355   :  { %390 = dma.vmem_to_hbm [thread:$0]  %s388_s20, 128, %s708_s7, [#allocation5]  }
 0x356   :  { %552 = dma.done.wait [#allocation5], 128  }
 0x357   :  { %553 = vsyncadd [#allocation5], 4294967168 }
 0x358   :  { %394 = vsyncpa [#allocation4], 1 }
 0x359   :  { %395 = vsyncpa [#allocation7], 1 }
 0x35a   :  { %396 = vsyncpa [#allocation5], 1 }

</bundles_post_ra>
